<compile_context>
chip_gen: v5e
topology: v5e:2x2
jax: 0.10.0
libtpu: 0.0.40
codegen_flags: <defaults>
</compile_context>

<pallas_src>
import functools

import jax
import jax.numpy as jnp
from jax import lax
from jax.experimental import pallas as pl
from jax.experimental.pallas import tpu as pltpu


def _dice_kernel(x_ref, t_ref, out_ref, *, rows_per_tile, tiles_per_half,
                 valid_rows, need_mask):
    """Grid: (half, tile-within-half).  out_ref is the (1,2,8,128) accumulator
    block for this half, resident across the inner ('arbitrary') axis."""
    h = pl.program_id(0)
    j = pl.program_id(1)

    @pl.when(j == 0)
    def _():
        out_ref[...] = jnp.zeros_like(out_ref)

    x = x_ref[...].astype(jnp.float32)
    t = t_ref[...].astype(jnp.float32)

    if need_mask:
        # Nominal (unclamped) row offset of this tile.  Rows >= valid_rows are
        # either stale VMEM from a partial edge block or a dummy overshoot
        # tile created by the 2-way split -> zero them before accumulating.
        row_start = (h * tiles_per_half + j) * rows_per_tile
        rows = lax.broadcasted_iota(jnp.int32, x.shape, 0) + row_start
        keep = rows < valid_rows
        x = jnp.where(keep, x, 0.0)
        t = jnp.where(keep, t, 0.0)

    # Fold (rows_per_tile, 128) -> (8, 128) by summing whole sublane groups:
    # the reshape keeps the lane dim and splits rows on an 8-boundary, so the
    # reduction is pure vreg-wise VPU adds (no XLU cross-lane reduce).
    r8 = rows_per_tile // 8
    out_ref[0, 0] += (x * t).reshape(r8, 8, 128).sum(axis=0)   # intersection
    out_ref[0, 1] += (x + t).reshape(r8, 8, 128).sum(axis=0)   # input + target


def dice(input_arr, target_arr, *, rows_per_tile=4096):
    """Pallas implementation of the Dice forward pass.  Returns an f32 scalar."""
    LANE = 128
    total = int(input_arr.size)
    assert int(target_arr.size) == total

    xf = input_arr.reshape(-1)
    tf = target_arr.reshape(-1)

    # View the flattened data as a contiguous (M, 128) slab.  Padding is only
    # materialized when total is not a multiple of 128 (rare for NCHW feature
    # maps); zero padding never changes any of the sums.
    lane_pad = (-total) % LANE
    if lane_pad:
        xf = jnp.pad(xf, (0, lane_pad))
        tf = jnp.pad(tf, (0, lane_pad))
    M = (total + lane_pad) // LANE

    R = max(8, (rows_per_tile // 8) * 8)        # block rows, multiple of 8
    if M < R:
        # Tiny input: a single block covering all rows (rounded up to a
        # multiple of 8 with zeros -- negligible copy at this size).
        row_pad = (-M) % 8
        if row_pad:
            xf = jnp.pad(xf, (0, row_pad * LANE))
            tf = jnp.pad(tf, (0, row_pad * LANE))
        M += row_pad
        R = M

    x2 = xf.reshape(M, LANE)
    t2 = tf.reshape(M, LANE)

    total_tiles = pl.cdiv(M, R)
    halves = 2 if total_tiles >= 2 else 1        # split across v7x's 2 TCs
    tiles_per_half = pl.cdiv(total_tiles, halves)
    # Masking is only needed if the last block is partial or the split
    # introduces dummy (overshooting) tiles.
    need_mask = (total_tiles * R != M) or (halves * tiles_per_half != total_tiles)

    def in_index_map(h, j):
        g = h * tiles_per_half + j
        # Clamp dummy overshoot tiles onto the last real block; the kernel
        # masks their contribution to zero.
        return (jnp.minimum(g, total_tiles - 1), 0)

    kernel = functools.partial(
        _dice_kernel,
        rows_per_tile=R,
        tiles_per_half=tiles_per_half,
        valid_rows=M,
        need_mask=need_mask,
    )

    partial_sums = pl.pallas_call(
        kernel,
        out_shape=jax.ShapeDtypeStruct((halves, 2, 8, LANE), jnp.float32),
        grid_spec=pltpu.PrefetchScalarGridSpec(
            num_scalar_prefetch=0,
            grid=(halves, tiles_per_half),
            in_specs=[
                pl.BlockSpec((R, LANE), in_index_map),
                pl.BlockSpec((R, LANE), in_index_map),
            ],
            out_specs=pl.BlockSpec((1, 2, 8, LANE), lambda h, j: (h, 0, 0, 0)),
        ),
        compiler_params=pltpu.CompilerParams(
            dimension_semantics=("parallel", "arbitrary"),
            vmem_limit_bytes=32 * 1024 * 1024,
        ),
    )(x2, t2)

    # Tiny final cross-lane reduce + division in XLA (a few KiB of data).
    sums = jnp.sum(partial_sums, axis=(0, 2, 3))          # (2,)
    return 2.0 * sums[0] / sums[1]


def _reference_dice(x, t):
    n = t.shape[0]
    xf = x.reshape(n, -1)
    tf = t.reshape(n, -1)
    return 2.0 * jnp.sum(xf * tf) / (jnp.sum(xf) + jnp.sum(tf))


if __name__ == "__main__":
    key = jax.random.PRNGKey(0)

    def check(shape, k):
        k1, k2 = jax.random.split(k)
        x = jax.nn.sigmoid(jax.random.normal(k1, shape, jnp.float32))
        t = (jax.random.uniform(k2, shape) > 0.5).astype(jnp.float32)
        got = dice(x, t)
        jax.block_until_ready(got)
        ref = _reference_dice(x, t)
        assert jnp.allclose(got, ref, rtol=2e-5, atol=1e-6), (shape, got, ref)

    keys = jax.random.split(key, 3)
    # Small NCHW case consistent with the module (segmentation-style maps).
    check((2, 4, 16, 16), keys[0])
    # Multi-tile case: exercises the 2-way split with an even tile count.
    check((2, 8, 256, 256), keys[1])
    # Ragged case: lane padding + partial edge block + odd tile count
    # (the clamped overshoot tile is fully masked).
    check((2, 6, 300, 300), keys[2])

    print("KERNEL_OK")
</pallas_src>

<mosaic_0001>
module attributes {stable_mosaic.version = 11 : i64} {
  func.func @_dice_kernel(%arg0: i32, %arg1: i32, %arg2: memref<16x128xf32, #tpu.memory_space<vmem>>, %arg3: memref<16x128xf32, #tpu.memory_space<vmem>>, %arg4: memref<1x2x8x128xf32, #tpu.memory_space<vmem>>) attributes {dimension_semantics = [#tpu.dimension_semantics<parallel>, #tpu.dimension_semantics<arbitrary>], iteration_bounds = array<i64: 1, 1>, scalar_prefetch = 0 : i64, scratch_operands = 0 : i64, tpu.core_type = #tpu.core_type<tc>, window_params = [{transform_indices = @transform_0, window_bounds = array<i64: 16, 128>}, {transform_indices = @transform_1, window_bounds = array<i64: 16, 128>}, {transform_indices = @transform_2, window_bounds = array<i64: 1, 2, 8, 128>}]} {
    %c0_i32 = arith.constant 0 : i32
    %0 = arith.cmpi eq, %arg1, %c0_i32 : i32
    %1 = arith.extui %0 : i1 to i32
    %c0_i32_0 = arith.constant 0 : i32
    %2 = arith.cmpi ne, %1, %c0_i32_0 : i32
    scf.if %2 {
      %cst_20 = arith.constant 0.000000e+00 : f32
      %23 = vector.broadcast %cst_20 : f32 to vector<1x2x8x128xf32>
      %c0_21 = arith.constant 0 : index
      %c0_22 = arith.constant 0 : index
      %c0_23 = arith.constant 0 : index
      %c0_24 = arith.constant 0 : index
      %24 = vector.load %arg4[%c0_21, %c0_22, %c0_23, %c0_24] : memref<1x2x8x128xf32, #tpu.memory_space<vmem>>, vector<1x2x8x128xf32>
      tpu.vector_store %arg4[%c0_21, %c0_22, %c0_23, %c0_24], %23 {strides = array<i32>} : memref<1x2x8x128xf32, #tpu.memory_space<vmem>>, vector<1x2x8x128xf32>,
    } else {
    }
    %c0 = arith.constant 0 : index
    %c0_1 = arith.constant 0 : index
    %3 = vector.load %arg2[%c0, %c0_1] : memref<16x128xf32, #tpu.memory_space<vmem>>, vector<16x128xf32>
    %c0_2 = arith.constant 0 : index
    %c0_3 = arith.constant 0 : index
    %4 = vector.load %arg3[%c0_2, %c0_3] : memref<16x128xf32, #tpu.memory_space<vmem>>, vector<16x128xf32>
    %c0_4 = arith.constant 0 : index
    %c0_5 = arith.constant 0 : index
    %c0_6 = arith.constant 0 : index
    %c0_7 = arith.constant 0 : index
    %5 = vector.load %arg4[%c0_4, %c0_5, %c0_6, %c0_7] : memref<1x2x8x128xf32, #tpu.memory_space<vmem>>, vector<1x1x8x128xf32>
    %6 = vector.shape_cast %5 : vector<1x1x8x128xf32> to vector<8x128xf32>
    %7 = arith.mulf %3, %4 : vector<16x128xf32>
    %8 = vector.shape_cast %7 : vector<16x128xf32> to vector<2x8x128xf32>
    %cst = arith.constant dense<0.000000e+00> : vector<8x128xf32>
    %9 = vector.multi_reduction <add>, %8, %cst [0] : vector<2x8x128xf32> to vector<8x128xf32>
    %10 = arith.addf %6, %9 : vector<8x128xf32>
    %c0_8 = arith.constant 0 : index
    %c0_9 = arith.constant 0 : index
    %c0_10 = arith.constant 0 : index
    %c0_11 = arith.constant 0 : index
    %11 = vector.load %arg4[%c0_8, %c0_9, %c0_10, %c0_11] : memref<1x2x8x128xf32, #tpu.memory_space<vmem>>, vector<1x1x8x128xf32>
    %12 = vector.shape_cast %11 : vector<1x1x8x128xf32> to vector<8x128xf32>
    %13 = vector.shape_cast %10 : vector<8x128xf32> to vector<1x1x8x128xf32>
    tpu.vector_store %arg4[%c0_8, %c0_9, %c0_10, %c0_11], %13 {strides = array<i32>} : memref<1x2x8x128xf32, #tpu.memory_space<vmem>>, vector<1x1x8x128xf32>,
    %c0_12 = arith.constant 0 : index
    %c1 = arith.constant 1 : index
    %c0_13 = arith.constant 0 : index
    %c0_14 = arith.constant 0 : index
    %14 = vector.load %arg4[%c0_12, %c1, %c0_13, %c0_14] : memref<1x2x8x128xf32, #tpu.memory_space<vmem>>, vector<1x1x8x128xf32>
    %15 = vector.shape_cast %14 : vector<1x1x8x128xf32> to vector<8x128xf32>
    %16 = arith.addf %3, %4 : vector<16x128xf32>
    %17 = vector.shape_cast %16 : vector<16x128xf32> to vector<2x8x128xf32>
    %cst_15 = arith.constant dense<0.000000e+00> : vector<8x128xf32>
    %18 = vector.multi_reduction <add>, %17, %cst_15 [0] : vector<2x8x128xf32> to vector<8x128xf32>
    %19 = arith.addf %15, %18 : vector<8x128xf32>
    %c0_16 = arith.constant 0 : index
    %c1_17 = arith.constant 1 : index
    %c0_18 = arith.constant 0 : index
    %c0_19 = arith.constant 0 : index
    %20 = vector.load %arg4[%c0_16, %c1_17, %c0_18, %c0_19] : memref<1x2x8x128xf32, #tpu.memory_space<vmem>>, vector<1x1x8x128xf32>
    %21 = vector.shape_cast %20 : vector<1x1x8x128xf32> to vector<8x128xf32>
    %22 = vector.shape_cast %19 : vector<8x128xf32> to vector<1x1x8x128xf32>
    tpu.vector_store %arg4[%c0_16, %c1_17, %c0_18, %c0_19], %22 {strides = array<i32>} : memref<1x2x8x128xf32, #tpu.memory_space<vmem>>, vector<1x1x8x128xf32>,
    return
  }
  func.func @transform_0(%arg0: i32, %arg1: i32) -> (i32, i32) {
    %c1_i32 = arith.constant 1 : i32
    %0 = arith.muli %arg0, %c1_i32 : i32
    %1 = arith.addi %0, %arg1 : i32
    %c0_i32 = arith.constant 0 : i32
    %2 = arith.minsi %1, %c0_i32 : i32
    %c0_i32_0 = arith.constant 0 : i32
    %c0_i32_1 = arith.constant 0 : i32
    return %2, %c0_i32_0 : i32, i32
  }
  func.func @transform_1(%arg0: i32, %arg1: i32) -> (i32, i32) {
    %c1_i32 = arith.constant 1 : i32
    %0 = arith.muli %arg0, %c1_i32 : i32
    %1 = arith.addi %0, %arg1 : i32
    %c0_i32 = arith.constant 0 : i32
    %2 = arith.minsi %1, %c0_i32 : i32
    %c0_i32_0 = arith.constant 0 : i32
    %c0_i32_1 = arith.constant 0 : i32
    return %2, %c0_i32_0 : i32, i32
  }
  func.func @transform_2(%arg0: i32, %arg1: i32) -> (i32, i32, i32, i32) {
    %c0_i32 = arith.constant 0 : i32
    %c0_i32_0 = arith.constant 0 : i32
    %c0_i32_1 = arith.constant 0 : i32
    %c0_i32_2 = arith.constant 0 : i32
    return %arg0, %c0_i32, %c0_i32_0, %c0_i32_1 : i32, i32, i32, i32
  }
}

</mosaic_0001>

<bundles_post_ra>
// kernel: tpu_custom_call.1
= control target key start
LH: loop header
LB: loop body
LE: loop exit
PB: predicated region body
PF: predicated region fallthrough
CT: control target
= control target key end

     0   :  { %7 = vsyncpa [#allocation3], 0  ;;  %s233_s0 = inlined_call_operand.hbm [shape: f32[16,128], index: 0, kind: input, shape index: {}]   ;;  %s234_s1 = inlined_call_operand.hbm [shape: f32[16,128], index: 1, kind: input, shape index: {}]   ;;  %s235_s2 = inlined_call_operand.hbm [shape: f32[1,2,8,128], index: 2, kind: output, shape index: {}]  }
   0x1   :  { %8 = vsyncpa [#allocation6], 0 }
   0x2   :  { %9 = vsyncpa [#allocation4], 0  ;;  %s20_s11 = sshll.u32 %s233_s0, 4  ;;  %s195_s12 = smov [#allocation2]   ;;  %s21_s11 = int_to_ptr.hbm [resolvable:$true] %s20_s11 }
   0x3   :  { %s22_s13 = sshll.u32 %s195_s12, 4  ;;  %s39_s16 = sshll.u32 %s234_s1, 4  ;;  %s23_s13 = int_to_ptr.vmem [resolvable:$true] %s22_s13  ;;  %s40_s16 = int_to_ptr.hbm [resolvable:$true] %s39_s16 }
   0x4   :  { %s196_s17 = smov 128   ;;  %s197_s18 = smov 8  }
   0x5   :  { %28 = dma.hbm_to_vmem [thread:$0]  %s21_s11, 256, %s23_s13, [#allocation3], %s196_s17, %s196_s17, %s197_s18  }
   0x6   :  { %s198_s19 = smov [#allocation5]  }
   0x7   :  { %s41_s20 = sshll.u32 %s198_s19, 4  ;;  %s42_s20 = int_to_ptr.vmem [resolvable:$true] %s41_s20 }
   0x8   :  { %47 = dma.hbm_to_vmem [thread:$0]  %s40_s16, 256, %s42_s20, [#allocation6], %s196_s17, %s196_s17, %s197_s18  }
   0x9   :  { %189 = dma.done.wait [#allocation3], 256  }
   0xa   :  { %190 = vsyncadd [#allocation3], 4294967040 }
   0xb   :  { %191 = dma.done.wait [#allocation6], 256  }
   0xc   :  { %192 = vsyncadd [#allocation6], 4294967040  ;;  %v70_v0 = vld [vmem:[#allocation2] sm:$0xff]  ;;  %v71_v1 = vld [vmem:[#allocation2 + $0x8] sm:$0xff]  ;;  %s199_s0 = smov [#allocation7]   ;;  %s93_s23 = sshll.u32 %s235_s2, 4  ;;  %s94_s23 = int_to_ptr.hbm [resolvable:$true] %s93_s23 }
   0xd   :  { %v72_v2 = vld [vmem:[#allocation5] sm:$0xff]  ;;  %v73_v3 = vld [vmem:[#allocation5 + $0x8] sm:$0xff]  ;;  %s91_s1 = sshll.u32 %s199_s0, 4  ;;  %s92_s1 = int_to_ptr.vmem [resolvable:$true] %s91_s1 }
   0xe   :  { %v75_v4 = vmul.f32 %v72_v2, %v70_v0  ;;  %v82_v5 = vadd.f32 %v72_v2, %v70_v0  ;;  %v76_v6 = vmul.f32 %v73_v3, %v71_v1  ;;  %v83_v7 = vadd.f32 %v73_v3, %v71_v1 }
  0x10   :  { %v77_v8 = vadd.f32 %v76_v6, %v75_v4  ;;  %v84_v9 = vadd.f32 %v83_v7, %v82_v5 }
  0x12   :  { %79 = vst [vmem:[#allocation7] sm:$0xff] %v77_v8 }
  0x13   :  { %86 = vst [vmem:[#allocation7 + $0x8] sm:$0xff] %v84_v9 }
  0x14   :  { %99 = dma.vmem_to_hbm [thread:$0]  %s92_s1, 256, %s94_s23, [#allocation4], %s196_s17, %s196_s17, %s197_s18  }
  0x15   :  { %193 = dma.done.wait [#allocation4], 256  }
  0x16   :  { %194 = vsyncadd [#allocation4], 4294967040 }
  0x17   :  { %104 = vsyncpa [#allocation3], 1 }
  0x18   :  { %105 = vsyncpa [#allocation6], 1 }
  0x19   :  { %106 = vsyncpa [#allocation4], 1 }

</bundles_post_ra>
